<compile_context>
chip_gen: v7x
topology: tpu7x:2x2x1
jax: 0.10.0
libtpu: 0.0.40
codegen_flags: <defaults>
</compile_context>

<pallas_src>
import functools

import jax
import jax.numpy as jnp
from jax.experimental import pallas as pl
from jax.experimental.pallas import tpu as pltpu

LANE = 128        # vreg lane width (last block dim)
TM_MAX = 8192     # max rows per grid step: 8192*128*4B = 4 MiB per f32 input block
NUM_SPLITS = 2    # leading "parallel" grid axis (dual-TC on v7x; harmless on 1-TC chips)


def _pick_tiling(rows, x_dtype, t_dtype):
    """Per-chip row-tile / sub-chunk / scoped-VMEM-limit selection."""
    try:
        vmem_cap = int(pltpu.get_tpu_info().vmem_capacity_bytes)
    except Exception:
        vmem_cap = 64 * 1024 * 1024          # conservative fallback (v7x-sized VMEM)

    bytes_per_row = LANE * (jnp.dtype(x_dtype).itemsize + jnp.dtype(t_dtype).itemsize)
    # Double-buffered input blocks get ~1/4 of physical VMEM; the rest is left
    # for compute intermediates / outputs / compiler scratch.
    #   v5e/v6e (128 MiB): 32 MiB buffer budget -> tm hits TM_MAX=8192 for f32
    #   v7x     ( 64 MiB): 16 MiB buffer budget -> tm = 8192 as well (16 MiB bufs)
    buf_budget = vmem_cap // 4
    tm_budget = buf_budget // (2 * bytes_per_row)
    tm_budget = max(512, min(TM_MAX, (tm_budget // 512) * 512))

    if rows <= 1024:
        tm = (rows // 8) * 8     # multiple of 8 (sublane tiling); ragged tail rows are masked
        sub = tm
    else:
        tm = min(tm_budget, (rows // 512) * 512)
        sub = 512                # bounds intermediates and fuses both folds per chunk

    # Explicit scoped-VMEM limit: above the 16 MiB (v5e) / 32 MiB (v6e/v7x)
    # defaults, well under physical capacity on every generation.
    vmem_limit = int(min(vmem_cap // 2, 64 * 1024 * 1024))
    return tm, sub, vmem_limit


def _iou_kernel(x_ref, t_ref, out_i_ref, out_t_ref, *,
                steps, nb, tm, sub, valid_last):
    """Accumulate per-core (8, LANE) partials of sum(sig(x)*t) and sum(sig(x)+t).

    x_ref, t_ref       : (tm, LANE)    VMEM tiles (native dtype, cast to f32 here)
    out_i_ref, out_t_ref: (1, 8, LANE) f32 per-core partial accumulators
                          (resident across the inner reduction axis)
    """
    c = pl.program_id(0)            # core-split ("parallel") axis
    s = pl.program_id(1)            # row-block ("arbitrary") reduction axis
    b = c * steps + s               # global row-block index
    last = nb - 1

    @pl.when(s == 0)
    def _():
        out_i_ref[...] = jnp.zeros_like(out_i_ref)
        out_t_ref[...] = jnp.zeros_like(out_t_ref)

    def chunk_body(off, valid_rows):
        xs = x_ref[pl.ds(off, sub), :].astype(jnp.float32)
        ts = t_ref[pl.ds(off, sub), :].astype(jnp.float32)
        # sigmoid(x) = 0.5*tanh(x/2) + 0.5 : one EUP op/element (vs exp + divide).
        xs = 0.5 * jnp.tanh(0.5 * xs) + 0.5
        prod = xs * ts                           # intersection contribution
        tot = xs + ts                            # total contribution
        if valid_rows is not None:
            rid = jax.lax.broadcasted_iota(jnp.int32, (sub, LANE), 0) + off
            keep = rid < valid_rows
            # NOTE: must stay a select -- out-of-range rows hold unspecified
            # data that may be NaN/Inf after tanh/mul; jnp.where does not
            # propagate NaN from the unselected branch.
            prod = jnp.where(keep, prod, 0.0)
            tot = jnp.where(keep, tot, 0.0)
        # (sub, LANE) -> (8, LANE): pure vreg-wise VPU adds (sub % 8 == 0).
        out_i_ref[...] += prod.reshape(sub // 8, 8, LANE).sum(axis=0).reshape(1, 8, LANE)
        out_t_ref[...] += tot.reshape(sub // 8, 8, LANE).sum(axis=0).reshape(1, 8, LANE)

    def accumulate(valid_rows):
        if tm == sub:
            chunk_body(0, valid_rows)
        else:
            @pl.loop(0, tm // sub)
            def _(j):
                chunk_body(pl.multiple_of(j * sub, sub), valid_rows)

    if valid_last == tm:
        # rows % tm == 0: every real block is fully valid.
        @pl.when(b <= last)
        def _():
            accumulate(None)
    else:
        @pl.when(b < last)
        def _():
            accumulate(None)

        @pl.when(b == last)
        def _():
            accumulate(valid_last)
    # b > last (grid slack from splitting nb blocks over the cores): no contribution;
    # the clamped index_map just re-reads the last block and we skip it here.


def iou_loss(inputs, targets, smooth=1.0):
    """Pallas TPU implementation of IoULoss.forward (returns a scalar f32)."""
    x = inputs.reshape(-1)          # keep native dtype; cast happens per-tile in VMEM
    t = targets.reshape(-1)
    n = x.shape[0]

    inter = jnp.float32(0.0)
    total = jnp.float32(0.0)

    rows = n // LANE
    n_main = rows * LANE if rows >= 8 else 0

    if n_main:
        # Free reshape into a lane-dense 2D slab (no pad, no full-tensor copy
        # when n is a multiple of 128; otherwise only the prefix is streamed
        # and the <=127 leftover elements are summed in the wrapper below).
        x2 = (x if n_main == n else x[:n_main]).reshape(rows, LANE)
        t2 = (t if n_main == n else t[:n_main]).reshape(rows, LANE)

        tm, sub, vmem_limit = _pick_tiling(rows, x.dtype, t.dtype)
        nb = -(-rows // tm)                                  # number of row blocks
        num_splits = NUM_SPLITS if nb >= NUM_SPLITS else 1
        steps = -(-nb // num_splits)                         # row blocks per core
        valid_last = rows - (nb - 1) * tm                    # valid rows in last block

        # Clamp so grid slack (num_splits*steps > nb) never produces an OOB DMA;
        # the kernel skips those steps.
        in_map = lambda c, s: (jnp.minimum(c * steps + s, nb - 1), 0)
        out_map = lambda c, s: (c, 0, 0)

        kernel = functools.partial(
            _iou_kernel, steps=steps, nb=nb, tm=tm, sub=sub, valid_last=valid_last)

        partial_i, partial_t = pl.pallas_call(
            kernel,
            out_shape=(
                jax.ShapeDtypeStruct((num_splits, 8, LANE), jnp.float32),
                jax.ShapeDtypeStruct((num_splits, 8, LANE), jnp.float32),
            ),
            grid_spec=pltpu.PrefetchScalarGridSpec(
                num_scalar_prefetch=0,
                grid=(num_splits, steps),
                in_specs=[
                    pl.BlockSpec((tm, LANE), in_map),
                    pl.BlockSpec((tm, LANE), in_map),
                ],
                out_specs=[
                    pl.BlockSpec((1, 8, LANE), out_map),
                    pl.BlockSpec((1, 8, LANE), out_map),
                ],
            ),
            compiler_params=pltpu.CompilerParams(
                dimension_semantics=("parallel", "arbitrary"),
                vmem_limit_bytes=vmem_limit,
            ),
        )(x2, t2)

        inter = inter + jnp.sum(partial_i)
        total = total + jnp.sum(partial_t)

    if n_main < n:
        # Ragged tail (< 128 elements, or whole input when n < 1024): plain JAX.
        xt = jax.nn.sigmoid(x[n_main:].astype(jnp.float32))
        tt = t[n_main:].astype(jnp.float32)
        inter = inter + jnp.sum(xt * tt)
        total = total + jnp.sum(xt + tt)

    union = total - inter
    return 1.0 - (inter + smooth) / (union + smooth)


def _reference(inputs, targets, smooth=1.0):
    x = jax.nn.sigmoid(inputs.astype(jnp.float32)).reshape(-1)
    t = targets.astype(jnp.float32).reshape(-1)
    inter = jnp.sum(x * t)
    total = jnp.sum(x + t)
    union = total - inter
    return 1.0 - (inter + smooth) / (union + smooth)


if __name__ == "__main__":
    key = jax.random.PRNGKey(0)
    k1, k2 = jax.random.split(key)
    # NCHW: batch=2, channels=4, spatial=16x16
    inputs = jax.random.normal(k1, (2, 4, 16, 16), dtype=jnp.float32)
    targets = (jax.random.uniform(k2, (2, 4, 16, 16)) > 0.5).astype(jnp.float32)

    loss = jax.block_until_ready(iou_loss(inputs, targets, smooth=1.0))
    ref = _reference(inputs, targets, smooth=1.0)
    assert jnp.allclose(loss, ref, atol=1e-5, rtol=1e-5), (loss, ref)

    # Second, non-multiple-of-tile size: exercises the partial last block,
    # the masked select path and the 2-way core split.
    k3, k4 = jax.random.split(k2)
    inputs2 = jax.random.normal(k3, (2, 4, 16, 17), dtype=jnp.float32)
    targets2 = (jax.random.uniform(k4, (2, 4, 16, 17)) > 0.5).astype(jnp.float32)
    loss2 = jax.block_until_ready(iou_loss(inputs2, targets2, smooth=1.0))
    ref2 = _reference(inputs2, targets2, smooth=1.0)
    assert jnp.allclose(loss2, ref2, atol=1e-5, rtol=1e-5), (loss2, ref2)

    print("KERNEL_OK")
</pallas_src>

<mosaic_0001>
module attributes {stable_mosaic.version = 11 : i64} {
  func.func @_iou_kernel(%arg0: i32, %arg1: i32, %arg2: memref<16x128xf32, #tpu.memory_space<vmem>>, %arg3: memref<16x128xf32, #tpu.memory_space<vmem>>, %arg4: memref<1x8x128xf32, #tpu.memory_space<vmem>>, %arg5: memref<1x8x128xf32, #tpu.memory_space<vmem>>) attributes {dimension_semantics = [#tpu.dimension_semantics<parallel>, #tpu.dimension_semantics<arbitrary>], iteration_bounds = array<i64: 1, 1>, scalar_prefetch = 0 : i64, scratch_operands = 0 : i64, tpu.core_type = #tpu.core_type<tc>, window_params = [{transform_indices = @transform_0, window_bounds = array<i64: 16, 128>}, {transform_indices = @transform_1, window_bounds = array<i64: 16, 128>}, {transform_indices = @transform_2, window_bounds = array<i64: 1, 8, 128>}, {transform_indices = @transform_3, window_bounds = array<i64: 1, 8, 128>}]} {
    %c1_i32 = arith.constant 1 : i32
    %0 = arith.muli %arg0, %c1_i32 : i32
    %1 = arith.addi %0, %arg1 : i32
    %c0_i32 = arith.constant 0 : i32
    %2 = arith.cmpi eq, %arg1, %c0_i32 : i32
    %3 = arith.extui %2 : i1 to i32
    %c0_i32_0 = arith.constant 0 : i32
    %4 = arith.cmpi ne, %3, %c0_i32_0 : i32
    scf.if %4 {
      %cst = arith.constant 0.000000e+00 : f32
      %8 = vector.broadcast %cst : f32 to vector<1x8x128xf32>
      %c0 = arith.constant 0 : index
      %c0_3 = arith.constant 0 : index
      %c0_4 = arith.constant 0 : index
      %9 = vector.load %arg4[%c0, %c0_3, %c0_4] : memref<1x8x128xf32, #tpu.memory_space<vmem>>, vector<1x8x128xf32>
      tpu.vector_store %arg4[%c0, %c0_3, %c0_4], %8 {strides = array<i32>} : memref<1x8x128xf32, #tpu.memory_space<vmem>>, vector<1x8x128xf32>,
      %cst_5 = arith.constant 0.000000e+00 : f32
      %10 = vector.broadcast %cst_5 : f32 to vector<1x8x128xf32>
      %c0_6 = arith.constant 0 : index
      %c0_7 = arith.constant 0 : index
      %c0_8 = arith.constant 0 : index
      %11 = vector.load %arg5[%c0_6, %c0_7, %c0_8] : memref<1x8x128xf32, #tpu.memory_space<vmem>>, vector<1x8x128xf32>
      tpu.vector_store %arg5[%c0_6, %c0_7, %c0_8], %10 {strides = array<i32>} : memref<1x8x128xf32, #tpu.memory_space<vmem>>, vector<1x8x128xf32>,
    } else {
    }
    %c0_i32_1 = arith.constant 0 : i32
    %5 = arith.cmpi sle, %1, %c0_i32_1 : i32
    %6 = arith.extui %5 : i1 to i32
    %c0_i32_2 = arith.constant 0 : i32
    %7 = arith.cmpi ne, %6, %c0_i32_2 : i32
    scf.if %7 {
      %c0 = arith.constant 0 : index
      %c0_3 = arith.constant 0 : index
      %8 = vector.load %arg2[%c0, %c0_3] : memref<16x128xf32, #tpu.memory_space<vmem>>, vector<16x128xf32>
      %c0_4 = arith.constant 0 : index
      %c0_5 = arith.constant 0 : index
      %9 = vector.load %arg3[%c0_4, %c0_5] : memref<16x128xf32, #tpu.memory_space<vmem>>, vector<16x128xf32>
      %cst = arith.constant 5.000000e-01 : f32
      %10 = vector.broadcast %cst : f32 to vector<16x128xf32>
      %11 = arith.mulf %10, %8 : vector<16x128xf32>
      %12 = math.tanh %11 : vector<16x128xf32>
      %cst_6 = arith.constant 5.000000e-01 : f32
      %13 = vector.broadcast %cst_6 : f32 to vector<16x128xf32>
      %14 = arith.mulf %13, %12 : vector<16x128xf32>
      %cst_7 = arith.constant 5.000000e-01 : f32
      %15 = vector.broadcast %cst_7 : f32 to vector<16x128xf32>
      %16 = arith.addf %14, %15 : vector<16x128xf32>
      %17 = arith.mulf %16, %9 : vector<16x128xf32>
      %18 = arith.addf %16, %9 : vector<16x128xf32>
      %c0_8 = arith.constant 0 : index
      %c0_9 = arith.constant 0 : index
      %c0_10 = arith.constant 0 : index
      %19 = vector.load %arg4[%c0_8, %c0_9, %c0_10] : memref<1x8x128xf32, #tpu.memory_space<vmem>>, vector<1x8x128xf32>
      %20 = vector.shape_cast %17 : vector<16x128xf32> to vector<2x8x128xf32>
      %cst_11 = arith.constant dense<0.000000e+00> : vector<8x128xf32>
      %21 = vector.multi_reduction <add>, %20, %cst_11 [0] : vector<2x8x128xf32> to vector<8x128xf32>
      %22 = vector.shape_cast %21 : vector<8x128xf32> to vector<1x8x128xf32>
      %23 = arith.addf %19, %22 : vector<1x8x128xf32>
      %c0_12 = arith.constant 0 : index
      %c0_13 = arith.constant 0 : index
      %c0_14 = arith.constant 0 : index
      %24 = vector.load %arg4[%c0_12, %c0_13, %c0_14] : memref<1x8x128xf32, #tpu.memory_space<vmem>>, vector<1x8x128xf32>
      tpu.vector_store %arg4[%c0_12, %c0_13, %c0_14], %23 {strides = array<i32>} : memref<1x8x128xf32, #tpu.memory_space<vmem>>, vector<1x8x128xf32>,
      %c0_15 = arith.constant 0 : index
      %c0_16 = arith.constant 0 : index
      %c0_17 = arith.constant 0 : index
      %25 = vector.load %arg5[%c0_15, %c0_16, %c0_17] : memref<1x8x128xf32, #tpu.memory_space<vmem>>, vector<1x8x128xf32>
      %26 = vector.shape_cast %18 : vector<16x128xf32> to vector<2x8x128xf32>
      %cst_18 = arith.constant dense<0.000000e+00> : vector<8x128xf32>
      %27 = vector.multi_reduction <add>, %26, %cst_18 [0] : vector<2x8x128xf32> to vector<8x128xf32>
      %28 = vector.shape_cast %27 : vector<8x128xf32> to vector<1x8x128xf32>
      %29 = arith.addf %25, %28 : vector<1x8x128xf32>
      %c0_19 = arith.constant 0 : index
      %c0_20 = arith.constant 0 : index
      %c0_21 = arith.constant 0 : index
      %30 = vector.load %arg5[%c0_19, %c0_20, %c0_21] : memref<1x8x128xf32, #tpu.memory_space<vmem>>, vector<1x8x128xf32>
      tpu.vector_store %arg5[%c0_19, %c0_20, %c0_21], %29 {strides = array<i32>} : memref<1x8x128xf32, #tpu.memory_space<vmem>>, vector<1x8x128xf32>,
    } else {
    }
    return
  }
  func.func @transform_0(%arg0: i32, %arg1: i32) -> (i32, i32) {
    %c1_i32 = arith.constant 1 : i32
    %0 = arith.muli %arg0, %c1_i32 : i32
    %1 = arith.addi %0, %arg1 : i32
    %c0_i32 = arith.constant 0 : i32
    %2 = arith.minsi %1, %c0_i32 : i32
    %c0_i32_0 = arith.constant 0 : i32
    %c0_i32_1 = arith.constant 0 : i32
    return %2, %c0_i32_0 : i32, i32
  }
  func.func @transform_1(%arg0: i32, %arg1: i32) -> (i32, i32) {
    %c1_i32 = arith.constant 1 : i32
    %0 = arith.muli %arg0, %c1_i32 : i32
    %1 = arith.addi %0, %arg1 : i32
    %c0_i32 = arith.constant 0 : i32
    %2 = arith.minsi %1, %c0_i32 : i32
    %c0_i32_0 = arith.constant 0 : i32
    %c0_i32_1 = arith.constant 0 : i32
    return %2, %c0_i32_0 : i32, i32
  }
  func.func @transform_2(%arg0: i32, %arg1: i32) -> (i32, i32, i32) {
    %c0_i32 = arith.constant 0 : i32
    %c0_i32_0 = arith.constant 0 : i32
    %c0_i32_1 = arith.constant 0 : i32
    return %arg0, %c0_i32, %c0_i32_0 : i32, i32, i32
  }
  func.func @transform_3(%arg0: i32, %arg1: i32) -> (i32, i32, i32) {
    %c0_i32 = arith.constant 0 : i32
    %c0_i32_0 = arith.constant 0 : i32
    %c0_i32_1 = arith.constant 0 : i32
    return %arg0, %c0_i32, %c0_i32_0 : i32, i32, i32
  }
}

</mosaic_0001>

<bundles_post_ra>
// kernel: tpu_custom_call.1
= control target key start
LH: loop header
LB: loop body
LE: loop exit
PB: predicated region body
PF: predicated region fallthrough
CT: control target
= control target key end

     0   :  { %9 = vsyncpa [#allocation3], 0  ;;  %s313_s0 = inlined_call_operand.hbm [shape: f32[16,128], index: 0, kind: input, shape index: {}]   ;;  %s314_s1 = inlined_call_operand.hbm [shape: f32[16,128], index: 1, kind: input, shape index: {}]   ;;  %s315_s2 = inlined_call_operand.hbm [shape: f32[1,8,128], index: 2, kind: output, shape index: {0}]   ;;  %s316_s3 = inlined_call_operand.hbm [shape: f32[1,8,128], index: 3, kind: output, shape index: {1}]  }
   0x1   :  { %10 = vsyncpa [#allocation6], 0 }
   0x2   :  { %11 = vsyncpa [#allocation4], 0 }
   0x3   :  { %12 = vsyncpa [#allocation9], 0  ;;  %s239_s12 = smov [#allocation2]   ;;  %s143_s16 = scalar_lea.hbm %s313_s0, 256 }
   0x4   :  { %s24_s13 = sshll.u32 %s239_s12, 4  ;;  %p144_p0 = scmp.ne.s32.totalorder %s313_s0, %s143_s16  ;;  %s25_s13 = int_to_ptr.vmem [resolvable:$true] %s24_s13 }
   0x5   :  { %p147_p1 = scmp.lt.u32.totalorder %s143_s16, %s313_s0 }
   0x7   :  { %p149_p2 = pnand %p147_p1, %p144_p0 }
   0x9   :  { %152 = shalt.err (!%p149_p2)
}
   0xa   :  { %s153_s21 = scalar_lea.vmem %s25_s13, 256  ;;  %p158_p4 = scmp.lt.s32.totalorder %s25_s13, %s25_s13 }
   0xb   :  { %p154_p3 = scmp.ne.s32.totalorder %s25_s13, %s153_s21  ;;  %p159_p5 = scmp.lt.s32.totalorder %s153_s21, %s153_s21 }
   0xd   :  { %p160_p6 = por %p159_p5, %p158_p4 }
   0xf   :  { %p161_p7 = pnand %p160_p6, %p154_p3 }
  0x11   :  { %164 = shalt.err (!%p161_p7)
}
  0x12   :  { %s240_s22 = smov 128   ;;  %s241_s23 = smov 8  }
  0x13   :  { %30 = dma.hbm_to_vmem [thread:$0]  %s313_s0, 256, %s25_s13, [#allocation3], %s240_s22, %s240_s22, %s241_s23  }
  0x14   :  { %s242_s26 = smov [#allocation5]   ;;  %s165_s30 = scalar_lea.hbm %s314_s1, 256 }
  0x15   :  { %s42_s27 = sshll.u32 %s242_s26, 4  ;;  %p166_p8 = scmp.ne.s32.totalorder %s314_s1, %s165_s30  ;;  %s43_s27 = int_to_ptr.vmem [resolvable:$true] %s42_s27 }
  0x16   :  { %p169_p9 = scmp.lt.u32.totalorder %s165_s30, %s314_s1 }
  0x18   :  { %p171_p10 = pnand %p169_p9, %p166_p8 }
  0x1a   :  { %174 = shalt.err (!%p171_p10)
}
  0x1b   :  { %s175_s8 = scalar_lea.vmem %s43_s27, 256  ;;  %p180_p12 = scmp.lt.s32.totalorder %s43_s27, %s43_s27 }
  0x1c   :  { %p176_p11 = scmp.ne.s32.totalorder %s43_s27, %s175_s8  ;;  %p181_p13 = scmp.lt.s32.totalorder %s175_s8, %s175_s8 }
  0x1e   :  { %p182_p0 = por %p181_p13, %p180_p12 }
  0x20   :  { %p183_p1 = pnand %p182_p0, %p176_p11 }
  0x22   :  { %186 = shalt.err (!%p183_p1)
}
  0x23   :  { %48 = dma.hbm_to_vmem [thread:$0]  %s314_s1, 256, %s43_s27, [#allocation6], %s240_s22, %s240_s22, %s241_s23  }
  0x24   :  { %231 = dma.done.wait [#allocation3], 256  }
  0x25   :  { %232 = vsyncadd [#allocation3], 4294967040 }
  0x26   :  { %233 = dma.done.wait [#allocation6], 256  }
  0x27   :  { %234 = vsyncadd [#allocation6], 4294967040  ;;  %v74_v0 = vld [vmem:[#allocation2] sm:$0xff]  ;;  %v75_v1 = vld [vmem:[#allocation2 + $0x8] sm:$0xff]  ;;  %s243_s1 = smov [#allocation7]   ;;  %s244_s11 = smov [#allocation8]  }
  0x28   :  { %v78_v2 = vmul.f32 0.5, %v74_v0  ;;  %v79_v3 = vmul.f32 0.5, %v75_v1  ;;  %v76_v7 = vld [vmem:[#allocation5] sm:$0xff]  ;;  %v77_v9 = vld [vmem:[#allocation5 + $0x8] sm:$0xff]  ;;  %s104_s10 = sshll.u32 %s243_s1, 4  ;;  %s114_s12 = sshll.u32 %s244_s11, 4  ;;  %s105_s10 = int_to_ptr.vmem [resolvable:$true] %s104_s10  ;;  %s115_s12 = int_to_ptr.vmem [resolvable:$true] %s114_s12 }
  0x29   :  { %s187_s13 = scalar_lea.vmem %s105_s10, 128  ;;  %p192_p3 = scmp.lt.s32.totalorder %s105_s10, %s105_s10 }
  0x2a   :  { %139 = vtanh.f32 %v78_v2  ;;  %p188_p2 = scmp.ne.s32.totalorder %s105_s10, %s187_s13  ;;  %p193_p4 = scmp.lt.s32.totalorder %s187_s13, %s187_s13 }
  0x2b   :  { %141 = vtanh.f32 %v79_v3 }
  0x2c   :  { %p194_p5 = por %p193_p4, %p192_p3 }
  0x2e   :  { %p195_p6 = pnand %p194_p5, %p188_p2 }
  0x34   :  { %v140_v4 = vpop.eup %139 }
  0x35   :  { %v142_v5 = vpop.eup %141  ;;  %v82_v6 = vmul.f32 0.5, %v140_v4 }
  0x36   :  { %v83_v8 = vmul.f32 0.5, %v142_v5 }
  0x37   :  { %v84_v10 = vadd.f32 0.5, %v82_v6 }
  0x38   :  { %v85_v11 = vadd.f32 0.5, %v83_v8 }
  0x39   :  { %v86_v12 = vmul.f32 %v84_v10, %v76_v7  ;;  %v88_v13 = vadd.f32 %v84_v10, %v76_v7 }
  0x3a   :  { %v87_v14 = vmul.f32 %v85_v11, %v77_v9  ;;  %v89_v15 = vadd.f32 %v85_v11, %v77_v9 }
  0x3c   :  { %v91_v16 = vadd.f32 %v87_v14, %v86_v12  ;;  %v95_v17 = vadd.f32 %v89_v15, %v88_v13 }
  0x3e   :  { %93 = vst [vmem:[#allocation7] sm:$0xff] %v91_v16  ;;  %97 = vst [vmem:[#allocation8] sm:$0xff] %v95_v17 }
  0x3f   :  { %198 = shalt.err (!%p195_p6)
}
  0x40   :  { %s199_s16 = scalar_lea.hbm %s315_s2, 128 }
  0x41   :  { %p200_p7 = scmp.ne.s32.totalorder %s315_s2, %s199_s16  ;;  %p203_p8 = scmp.lt.u32.totalorder %s199_s16, %s315_s2 }
  0x43   :  { %p205_p9 = pnand %p203_p8, %p200_p7 }
  0x45   :  { %208 = shalt.err (!%p205_p9)
}
  0x46   :  { %107 = dma.vmem_to_hbm [thread:$0]  %s105_s10, 128, %s315_s2, [#allocation4]  }
  0x47   :  { %s209_s23 = scalar_lea.vmem %s115_s12, 128  ;;  %p214_p11 = scmp.lt.s32.totalorder %s115_s12, %s115_s12 }
  0x48   :  { %p210_p10 = scmp.ne.s32.totalorder %s115_s12, %s209_s23  ;;  %p215_p12 = scmp.lt.s32.totalorder %s209_s23, %s209_s23 }
  0x4a   :  { %p216_p13 = por %p215_p12, %p214_p11 }
  0x4c   :  { %p217_p0 = pnand %p216_p13, %p210_p10 }
  0x4e   :  { %220 = shalt.err (!%p217_p0)
}
  0x4f   :  { %s221_s26 = scalar_lea.hbm %s316_s3, 128 }
  0x50   :  { %p222_p1 = scmp.ne.s32.totalorder %s316_s3, %s221_s26  ;;  %p225_p2 = scmp.lt.u32.totalorder %s221_s26, %s316_s3 }
  0x52   :  { %p227_p3 = pnand %p225_p2, %p222_p1 }
  0x54   :  { %230 = shalt.err (!%p227_p3)
}
  0x55   :  { %117 = dma.vmem_to_hbm [thread:$0]  %s115_s12, 128, %s316_s3, [#allocation9]  }
  0x56   :  { %235 = dma.done.wait [#allocation4], 128  }
  0x57   :  { %236 = vsyncadd [#allocation4], 4294967168 }
  0x58   :  { %237 = dma.done.wait [#allocation9], 128  }
  0x59   :  { %238 = vsyncadd [#allocation9], 4294967168 }
  0x5a   :  { %124 = vsyncpa [#allocation3], 1 }
  0x5b   :  { %125 = vsyncpa [#allocation6], 1 }
  0x5c   :  { %126 = vsyncpa [#allocation4], 1 }
  0x5d   :  { %127 = vsyncpa [#allocation9], 1 }

</bundles_post_ra>
